<compile_context>
chip_gen: v6e
topology: v6e:2x2x1
jax: 0.10.0
libtpu: 0.0.40
codegen_flags: <defaults>
</compile_context>

<pallas_src>
import jax
import jax.numpy as jnp
from jax import lax
from jax.experimental import pallas as pl
from jax.experimental.pallas import tpu as pltpu


def _kd_mlp_kernel(x_ref, w1t_ref, b1_ref, w2t_ref, b2_ref, w3_ref, b3_ref, o_ref):
    # x_ref  : (TB, D)      w1t_ref: (H1, D)    b1_ref : (H1, 1)
    # w2t_ref: (H2, H1)     b2_ref : (H2, 1)    w3_ref : (H2, 1)
    # b3_ref : (1,) in SMEM
    # o_ref  : (1, 1, TB)   lane-dense output row
    x = x_ref[...]

    # layer 1 (MXU, transposed): contract D on both operands -> (H1, TB) == h1^T.
    # Keeps the batch axis on lanes from the very first layer.
    h1t = lax.dot_general(
        w1t_ref[...], x,
        dimension_numbers=(((1,), (1,)), ((), ())),
        preferred_element_type=jnp.float32,
    ) + b1_ref[...]
    h1t = jnp.maximum(h1t, 0.0)

    # layer 2 (MXU): (H2, H1) @ (H1, TB) -> (H2, TB) == h2^T
    h2t = jnp.dot(w2t_ref[...], h1t, preferred_element_type=jnp.float32) + b2_ref[...]
    h2t = jnp.maximum(h2t, 0.0)

    # layer 3 (VPU multiply + XLU sublane reduce, no MXU): (H2, TB) -> (1, TB)
    out_row = jnp.sum(h2t * w3_ref[...], axis=0, keepdims=True) + b3_ref[0]

    o_ref[...] = out_row[None].astype(o_ref.dtype)


def _round_up(n, m):
    return ((n + m - 1) // m) * m


def _hw_info():
    """Returns (per-core VMEM capacity in bytes, chip-has-two-tensorcores)."""
    vmem_cap = 64 * 1024 * 1024  # conservative (v7x-sized) fallback
    try:
        vmem_cap = int(pltpu.get_tpu_info().vmem_capacity_bytes)
    except Exception:
        pass
    # v7x: 64 MiB VMEM / TensorCore, 2 TCs per chip.  v5e / v6e: 128 MiB, 1 TC.
    two_tc = vmem_cap <= 64 * 1024 * 1024
    return vmem_cap, two_tc


def _pick_tile(B, D, H1, H2, tile_b, x_itemsize, vmem_budget_bytes):
    """Largest 128-multiple batch tile that fits the scoped-VMEM budget."""
    dp = _round_up(max(D, 1), 128)          # x lanes pad to 128 in VMEM
    h1p = _round_up(H1, 128)
    h2p = _round_up(H2, 8)

    # bytes that scale with the batch tile:
    #   double-buffered x tile + f32 h1^T / h2^T intermediates + double-buffered out row
    per_row = 2 * dp * x_itemsize + (H1 + H2) * 4 + 2 * 8 * 4
    # resident parameter buffers (double-buffered by the pipeline) + compiler scratch
    fixed = 2 * (_round_up(H1, 8) * dp * x_itemsize      # w1^T
                 + _round_up(H1, 8) * 128 * 4            # b1
                 + h2p * h1p * 4                         # w2^T
                 + 2 * h2p * 128 * 4)                    # b2, w3
    fixed += 2 * 1024 * 1024

    tb_cap = max(128, ((vmem_budget_bytes - fixed) // per_row) // 128 * 128)
    tb = max(128, min(_round_up(tile_b, 128), tb_cap))
    tb = min(tb, _round_up(B, 128))
    return tb


def kd_prediction_forward(x, params, *, tile_b=8192, stream_bf16=False):
    """x: [B, input_dim] float32 -> [B] float32 (matches KdPredictionModule.forward)."""
    w1, b1, w2, b2, w3, b3 = params
    B, D = x.shape
    H1 = w1.shape[1]
    H2 = w2.shape[1]

    vmem_cap, two_tc = _hw_info()
    # leave headroom: ~48 MiB usable on 64 MiB v7x, ~96 MiB on 128 MiB v5e/v6e
    vmem_budget = (vmem_cap // 4) * 3

    # optional narrow streaming of the bandwidth-dominant input (MXU accumulates f32)
    x_in = x.astype(jnp.bfloat16) if stream_bf16 else x
    x_itemsize = 2 if stream_bf16 else 4

    tb = _pick_tile(B, D, H1, H2, tile_b, x_itemsize, vmem_budget)
    # only on 2-TensorCore chips: keep >= 2 grid steps so megacore sharding can engage
    if two_tc and _round_up(B, 128) >= 256:
        tb = min(tb, _round_up(pl.cdiv(_round_up(B, 128), 2), 128))

    # Large batches: no input padding — cdiv grid + ragged last block (garbage tail rows
    # are sliced off below).  Tiny batches (B < one tile): pad to a single tile (cheap).
    n_rows = B
    if B < tb:
        x_in = jnp.pad(x_in, ((0, tb - B), (0, 0)))
        n_rows = tb
    grid_b = pl.cdiv(n_rows, tb)

    # reshape / transpose the (tiny) parameters once, outside the kernel
    w1t = w1.T                                   # (H1, D)
    if stream_bf16:
        w1t = w1t.astype(jnp.bfloat16)
    b1_r = b1.reshape(H1, 1)
    w2t = w2.T                                   # (H2, H1)
    b2_r = b2.reshape(H2, 1)
    w3_r = w3.reshape(H2, 1)
    b3_r = b3.reshape(1)

    param_bytes = 4 * (D * H1 + H1 + H1 * H2 + H2 + H2 + 1)
    cost = pl.CostEstimate(
        flops=2 * B * (D * H1 + H1 * H2 + H2),
        transcendentals=0,
        bytes_accessed=B * D * x_itemsize + B * 4 + param_bytes,
    )

    out = pl.pallas_call(
        _kd_mlp_kernel,
        out_shape=jax.ShapeDtypeStruct((grid_b, 1, tb), jnp.float32),
        grid_spec=pltpu.PrefetchScalarGridSpec(
            num_scalar_prefetch=0,
            grid=(grid_b,),
            in_specs=[
                pl.BlockSpec((tb, D), lambda i: (i, 0)),     # x tile (streamed from HBM)
                pl.BlockSpec((H1, D), lambda i: (0, 0)),     # w1^T (resident)
                pl.BlockSpec((H1, 1), lambda i: (0, 0)),     # b1 (column)
                pl.BlockSpec((H2, H1), lambda i: (0, 0)),    # w2^T
                pl.BlockSpec((H2, 1), lambda i: (0, 0)),     # b2 (column)
                pl.BlockSpec((H2, 1), lambda i: (0, 0)),     # w3 (column)
                pl.BlockSpec(memory_space=pltpu.MemorySpace.SMEM),  # b3 scalar
            ],
            out_specs=pl.BlockSpec((1, 1, tb), lambda i: (i, 0, 0)),
        ),
        compiler_params=pltpu.CompilerParams(
            dimension_semantics=("parallel",),
            vmem_limit_bytes=int(vmem_budget),
        ),
        cost_estimate=cost,
    )(x_in, w1t, b1_r, w2t, b2_r, w3_r, b3_r)

    return out.reshape(-1)[:B]


def init_params(key, input_dim, hidden_dim1=32, hidden_dim2=16):
    """Deterministic parameter init (uniform like torch Linear default)."""
    ks = jax.random.split(key, 6)

    def lin(kw, kb, fan_in, fan_out):
        bound = 1.0 / jnp.sqrt(fan_in)
        w = jax.random.uniform(kw, (fan_in, fan_out), jnp.float32, -bound, bound)
        b = jax.random.uniform(kb, (fan_out,), jnp.float32, -bound, bound)
        return w, b

    w1, b1 = lin(ks[0], ks[1], input_dim, hidden_dim1)
    w2, b2 = lin(ks[2], ks[3], hidden_dim1, hidden_dim2)
    w3, b3 = lin(ks[4], ks[5], hidden_dim2, 1)
    return (w1, b1, w2, b2, w3, b3)


def reference_forward(x, params):
    w1, b1, w2, b2, w3, b3 = params
    h1 = jax.nn.relu(x @ w1 + b1)
    h2 = jax.nn.relu(h1 @ w2 + b2)
    return (h2 @ w3 + b3)[..., 0]


if __name__ == "__main__":
    key = jax.random.PRNGKey(0)
    k_x1, k_x2, k_p = jax.random.split(key, 3)

    input_dim = 32
    params = init_params(k_p, input_dim, hidden_dim1=32, hidden_dim2=16)

    # small batch (single grid step, padded to one tile)
    x1 = jax.random.normal(k_x1, (16, input_dim), dtype=jnp.float32)
    y1 = jax.block_until_ready(kd_prediction_forward(x1, params))
    y1_ref = reference_forward(x1, params)
    assert y1.shape == (16,)
    assert jnp.allclose(y1, y1_ref, atol=1e-4, rtol=1e-5), "mismatch vs reference (B=16)"

    # awkward batch size (exercises cdiv grid / ragged last block, no input pad on 1-TC,
    # or the 2-step megacore split on v7x-class parts)
    x2 = jax.random.normal(k_x2, (200, input_dim), dtype=jnp.float32)
    y2 = jax.block_until_ready(kd_prediction_forward(x2, params))
    y2_ref = reference_forward(x2, params)
    assert y2.shape == (200,)
    assert jnp.allclose(y2, y2_ref, atol=1e-4, rtol=1e-5), "mismatch vs reference (B=200)"

    # bf16-streamed fast path (halves HBM bytes on the bandwidth-bound input)
    y3 = jax.block_until_ready(kd_prediction_forward(x2, params, stream_bf16=True))
    assert y3.shape == (200,)
    assert jnp.allclose(y3, y2_ref, atol=5e-2, rtol=5e-2), "mismatch vs reference (bf16)"

    print("KERNEL_OK")
</pallas_src>

<mosaic_0001>
module attributes {stable_mosaic.version = 11 : i64} {
  func.func @_kd_mlp_kernel(%arg0: i32, %arg1: memref<128x32xf32, #tpu.memory_space<vmem>>, %arg2: memref<32x32xf32, #tpu.memory_space<vmem>>, %arg3: memref<32x1xf32, #tpu.memory_space<vmem>>, %arg4: memref<16x32xf32, #tpu.memory_space<vmem>>, %arg5: memref<16x1xf32, #tpu.memory_space<vmem>>, %arg6: memref<16x1xf32, #tpu.memory_space<vmem>>, %arg7: memref<1xf32, #tpu.memory_space<smem>>, %arg8: memref<1x1x128xf32, #tpu.memory_space<vmem>>) attributes {dimension_semantics = [#tpu.dimension_semantics<parallel>], iteration_bounds = array<i64: 1>, scalar_prefetch = 0 : i64, scratch_operands = 0 : i64, tpu.core_type = #tpu.core_type<tc>, window_params = [{transform_indices = @transform_0, window_bounds = array<i64: 128, 32>}, {pipeline_mode = #tpu.pipeline_mode<synchronous>, transform_indices = @transform_1, window_bounds = array<i64: 32, 32>}, {pipeline_mode = #tpu.pipeline_mode<synchronous>, transform_indices = @transform_2, window_bounds = array<i64: 32, 1>}, {pipeline_mode = #tpu.pipeline_mode<synchronous>, transform_indices = @transform_3, window_bounds = array<i64: 16, 32>}, {pipeline_mode = #tpu.pipeline_mode<synchronous>, transform_indices = @transform_4, window_bounds = array<i64: 16, 1>}, {pipeline_mode = #tpu.pipeline_mode<synchronous>, transform_indices = @transform_5, window_bounds = array<i64: 16, 1>}, {transform_indices = @transform_6, window_bounds = array<i64: 1>}, {transform_indices = @transform_7, window_bounds = array<i64: 1, 1, 128>}]} {
    %c0 = arith.constant 0 : index
    %c0_0 = arith.constant 0 : index
    %0 = vector.load %arg1[%c0, %c0_0] : memref<128x32xf32, #tpu.memory_space<vmem>>, vector<128x32xf32>
    %c0_1 = arith.constant 0 : index
    %c0_2 = arith.constant 0 : index
    %1 = vector.load %arg2[%c0_1, %c0_2] : memref<32x32xf32, #tpu.memory_space<vmem>>, vector<32x32xf32>
    %cst = arith.constant dense<0.000000e+00> : vector<32x128xf32>
    %2 = tpu.matmul %1, %0, %cst {dimension_numbers = #tpu.dot_dimension_numbers<[1], [1], [0], [0], [0, 0, 1, 0], [], []>} : vector<32x32xf32>, vector<128x32xf32>, vector<32x128xf32> -> vector<32x128xf32>
    %c0_3 = arith.constant 0 : index
    %c0_4 = arith.constant 0 : index
    %3 = vector.load %arg3[%c0_3, %c0_4] : memref<32x1xf32, #tpu.memory_space<vmem>>, vector<32x1xf32>
    %4 = vector.broadcast %3 : vector<32x1xf32> to vector<32x128xf32>
    %5 = arith.addf %2, %4 : vector<32x128xf32>
    %cst_5 = arith.constant 0.000000e+00 : f32
    %6 = vector.broadcast %cst_5 : f32 to vector<32x128xf32>
    %7 = arith.maximumf %5, %6 : vector<32x128xf32>
    %c0_6 = arith.constant 0 : index
    %c0_7 = arith.constant 0 : index
    %8 = vector.load %arg4[%c0_6, %c0_7] : memref<16x32xf32, #tpu.memory_space<vmem>>, vector<16x32xf32>
    %cst_8 = arith.constant dense<0.000000e+00> : vector<16x128xf32>
    %9 = tpu.matmul %8, %7, %cst_8 {dimension_numbers = #tpu.dot_dimension_numbers<[1], [0], [0], [1], [0, 0, 1, 1], [], []>} : vector<16x32xf32>, vector<32x128xf32>, vector<16x128xf32> -> vector<16x128xf32>
    %c0_9 = arith.constant 0 : index
    %c0_10 = arith.constant 0 : index
    %10 = vector.load %arg5[%c0_9, %c0_10] : memref<16x1xf32, #tpu.memory_space<vmem>>, vector<16x1xf32>
    %11 = vector.broadcast %10 : vector<16x1xf32> to vector<16x128xf32>
    %12 = arith.addf %9, %11 : vector<16x128xf32>
    %cst_11 = arith.constant 0.000000e+00 : f32
    %13 = vector.broadcast %cst_11 : f32 to vector<16x128xf32>
    %14 = arith.maximumf %12, %13 : vector<16x128xf32>
    %c0_12 = arith.constant 0 : index
    %c0_13 = arith.constant 0 : index
    %15 = vector.load %arg6[%c0_12, %c0_13] : memref<16x1xf32, #tpu.memory_space<vmem>>, vector<16x1xf32>
    %16 = vector.broadcast %15 : vector<16x1xf32> to vector<16x128xf32>
    %17 = arith.mulf %14, %16 : vector<16x128xf32>
    %cst_14 = arith.constant dense<0.000000e+00> : vector<128xf32>
    %18 = vector.multi_reduction <add>, %17, %cst_14 [0] : vector<16x128xf32> to vector<128xf32>
    %19 = vector.shape_cast %18 : vector<128xf32> to vector<1x128xf32>
    %c0_15 = arith.constant 0 : index
    %20 = memref.load %arg7[%c0_15] : memref<1xf32, #tpu.memory_space<smem>>
    %21 = vector.broadcast %20 : f32 to vector<1x128xf32>
    %22 = arith.addf %19, %21 : vector<1x128xf32>
    %23 = vector.shape_cast %22 : vector<1x128xf32> to vector<1x1x128xf32>
    %c0_16 = arith.constant 0 : index
    %c0_17 = arith.constant 0 : index
    %c0_18 = arith.constant 0 : index
    %24 = vector.load %arg8[%c0_16, %c0_17, %c0_18] : memref<1x1x128xf32, #tpu.memory_space<vmem>>, vector<1x1x128xf32>
    tpu.vector_store %arg8[%c0_16, %c0_17, %c0_18], %23 {strides = array<i32>} : memref<1x1x128xf32, #tpu.memory_space<vmem>>, vector<1x1x128xf32>,
    return
  }
  func.func @transform_0(%arg0: i32) -> (i32, i32) {
    %c0_i32 = arith.constant 0 : i32
    %c0_i32_0 = arith.constant 0 : i32
    return %arg0, %c0_i32 : i32, i32
  }
  func.func @transform_1(%arg0: i32) -> (i32, i32) {
    %c0_i32 = arith.constant 0 : i32
    %c0_i32_0 = arith.constant 0 : i32
    %c0_i32_1 = arith.constant 0 : i32
    return %c0_i32, %c0_i32_0 : i32, i32
  }
  func.func @transform_2(%arg0: i32) -> (i32, i32) {
    %c0_i32 = arith.constant 0 : i32
    %c0_i32_0 = arith.constant 0 : i32
    %c0_i32_1 = arith.constant 0 : i32
    return %c0_i32, %c0_i32_0 : i32, i32
  }
  func.func @transform_3(%arg0: i32) -> (i32, i32) {
    %c0_i32 = arith.constant 0 : i32
    %c0_i32_0 = arith.constant 0 : i32
    %c0_i32_1 = arith.constant 0 : i32
    return %c0_i32, %c0_i32_0 : i32, i32
  }
  func.func @transform_4(%arg0: i32) -> (i32, i32) {
    %c0_i32 = arith.constant 0 : i32
    %c0_i32_0 = arith.constant 0 : i32
    %c0_i32_1 = arith.constant 0 : i32
    return %c0_i32, %c0_i32_0 : i32, i32
  }
  func.func @transform_5(%arg0: i32) -> (i32, i32) {
    %c0_i32 = arith.constant 0 : i32
    %c0_i32_0 = arith.constant 0 : i32
    %c0_i32_1 = arith.constant 0 : i32
    return %c0_i32, %c0_i32_0 : i32, i32
  }
  func.func @transform_6(%arg0: i32) -> i32 {
    %c0_i32 = arith.constant 0 : i32
    %c0_i32_0 = arith.constant 0 : i32
    return %c0_i32 : i32
  }
  func.func @transform_7(%arg0: i32) -> (i32, i32, i32) {
    %c0_i32 = arith.constant 0 : i32
    %c0_i32_0 = arith.constant 0 : i32
    %c0_i32_1 = arith.constant 0 : i32
    return %arg0, %c0_i32, %c0_i32_0 : i32, i32, i32
  }
}

</mosaic_0001>

<bundles_post_ra>
// kernel: tpu_custom_call.1
= control target key start
LH: loop header
LB: loop body
LE: loop exit
PB: predicated region body
PF: predicated region fallthrough
CT: control target
= control target key end

     0   :  { %vm72_vm0 = vcmask 261120   ;;  %v481_v2 = vmov 0   ;;  %s657_s0 = inlined_call_operand.vmem [shape: f32[128,32], index: 0, kind: input, shape index: {}]   ;;  %s658_s1 = inlined_call_operand.vmem [shape: f32[32,32], index: 1, kind: input, shape index: {}]   ;;  %s659_s2 = inlined_call_operand.vmem [shape: f32[32,1], index: 2, kind: input, shape index: {}]   ;;  %s660_s3 = inlined_call_operand.vmem [shape: f32[16,32], index: 3, kind: input, shape index: {}]   ;;  %s661_s4 = inlined_call_operand.vmem [shape: f32[16,1], index: 4, kind: input, shape index: {}]   ;;  %s662_s5 = inlined_call_operand.vmem [shape: f32[16,1], index: 5, kind: input, shape index: {}]   ;;  %s663_s6 = inlined_call_operand.<no memory space> [shape: f32[1], index: 6, kind: input, shape index: {}]   ;;  %s664_s7 = inlined_call_operand.hbm [shape: f32[1,1,128], index: 7, kind: output, shape index: {}]  }
   0x1   :  { %v43_v0 = vld [vmem:[%s657_s0 + $0x78] sm:$0xff]  ;;  %v42_v1 = vld [vmem:[%s657_s0 + $0x70] sm:$0xff]  ;;  %457 = vset.pattern.permute.xlu0 %v481_v2  ;;  %458 = vset.pattern.permute.xlu1 %v481_v2  ;;  %v41_v3 = vld [vmem:[%s657_s0 + $0x68] sm:$0xff] }
   0x2   :  { %406 = vmatprep.subr.msk.mxu0 %vm72_vm0, %v43_v0  ;;  %v44_v4 = vld [vmem:[%s658_s1] sm:$0xff]  ;;  %v51_v5 = vld [vmem:[%s659_s2 + $0x18] sm:$0xff]  ;;  %v49_v6 = vld [vmem:[%s659_s2 + $0x8] sm:$0xff] }
   0x3   :  { %407 = vmatpush3.xpose.msk.msra.mxu0 %vm72_vm0, %v43_v0  ;;  %438 = vmatprep.mubr.msk.f32.mxu0 %vm72_vm0, %v44_v4  ;;  %v40_v7 = vld [vmem:[%s657_s0 + $0x60] sm:$0xff]  ;;  %v50_v8 = vld [vmem:[%s659_s2 + $0x10] sm:$0xff] }
   0x4   :  { %408 = vmatprep.subr.msk.mxu0 %vm72_vm0, %v42_v1  ;;  %69 = vperm.xlu0 %457, %v51_v5   ;;  %v48_v9 = vld [vmem:[%s659_s2] sm:$0xff] }
   0x5   :  { %59 = vperm.xlu1 %458, %v49_v6  }
   0x7   :  { %409 = vmatpush3.xpose.msk.msra.mxu0 %vm72_vm0, %v42_v1 }
   0x8   :  { %410 = vmatprep.subr.msk.mxu0 %vm72_vm0, %v41_v3 }
   0x9   :  { %13 = vsyncpa [#allocation4], 0  ;;  %64 = vperm.xlu0 %457, %v50_v8   ;;  %v39_v10 = vld [vmem:[%s657_s0 + $0x58] sm:$0xff]  ;;  %v224_v11 = vld [vmem:[%s661_s4] sm:$0xff]  ;;  %54 = vperm.xlu1 %458, %v48_v9   ;;  %v341_v1 = vstv %s663_s6  ;;  %s482_s9 = smov [#allocation3]  }
   0xa   :  { %v225_v12 = vld [vmem:[%s661_s4 + $0x8] sm:$0xff]  ;;  %v38_v13 = vld [vmem:[%s657_s0 + $0x50] sm:$0xff]  ;;  %v319_v14 = vld [vmem:[%s662_s5] sm:$0xff] }
   0xb   :  { %411 = vmatpush3.xpose.msk.msra.mxu0 %vm72_vm0, %v41_v3  ;;  %v320_v15 = vld [vmem:[%s662_s5 + $0x8] sm:$0xff]  ;;  %v36_v17 = vld [vmem:[%s657_s0 + $0x40] sm:$0xff]  ;;  %v35_v18 = vld [vmem:[%s657_s0 + $0x38] sm:$0xff]  ;;  %s350_s5 = sshll.u32 %s482_s9, 4  ;;  %s351_s5 = int_to_ptr.vmem [resolvable:$true] %s350_s5 }
   0xc   :  { %412 = vmatprep.subr.msk.mxu0 %vm72_vm0, %v40_v7  ;;  %v37_v16 = vld [vmem:[%s657_s0 + $0x48] sm:$0xff]  ;;  %v34_v19 = vld [vmem:[%s657_s0 + $0x30] sm:$0xff]  ;;  %v32_v21 = vld [vmem:[%s657_s0 + $0x20] sm:$0xff]  ;;  %s459_s10 = scalar_lea.vmem %s351_s5, 16  ;;  %s463_s11 = scalar_lea.vmem %s351_s5, 32 }
   0xd   :  { %228 = vperm.xlu0 %457, %v224_v11   ;;  %233 = vperm.xlu1 %458, %v225_v12   ;;  %v33_v20 = vld [vmem:[%s657_s0 + $0x28] sm:$0xff]  ;;  %v31_v22 = vld [vmem:[%s657_s0 + $0x18] sm:$0xff]  ;;  %v30_v23 = vld [vmem:[%s657_s0 + $0x10] sm:$0xff]  ;;  %p460_p0 = scmp.ne.s32.totalorder %s351_s5, %s459_s10  ;;  %p464_p1 = scmp.lt.s32.totalorder %s351_s5, %s351_s5 }
   0xe   :  { %v29_v24 = vld [vmem:[%s657_s0 + $0x8] sm:$0xff]  ;;  %v28_v25 = vld [vmem:[%s657_s0] sm:$0xff]  ;;  %v46_v27 = vld [vmem:[%s658_s1 + $0x10] sm:$0xff]  ;;  %p465_p2 = scmp.lt.s32.totalorder %s463_s11, %s459_s10 }
   0xf   :  { %413 = vmatpush3.xpose.msk.msra.mxu0 %vm72_vm0, %v40_v7  ;;  %v45_v26 = vld [vmem:[%s658_s1 + $0x8] sm:$0xff]  ;;  %v47_v28 = vld [vmem:[%s658_s1 + $0x18] sm:$0xff]  ;;  %v222_v29 = vld [vmem:[%s660_s3] sm:$0xff] }
  0x10   :  { %414 = vmatprep.subr.msk.mxu0 %vm72_vm0, %v39_v10  ;;  %452 = vmatprep.mubr.msk.f32.mxu1 %vm72_vm0, %v222_v29  ;;  %v223_v46 = vld [vmem:[%s660_s3 + $0x8] sm:$0xff]  ;;  %p466_p3 = por %p465_p2, %p464_p1 }
  0x11   :  { %323 = vperm.xlu0 %457, %v319_v14   ;;  %328 = vperm.xlu1 %458, %v320_v15  }
  0x12   :  { %p467_p4 = pnand %p466_p3, %p460_p0 }
  0x13   :  { %415 = vmatpush3.xpose.msk.msra.mxu0 %vm72_vm0, %v39_v10 }
  0x14   :  { %416 = vmatprep.subr.msk.mxu0 %vm72_vm0, %v38_v13 }
  0x17   :  { %417 = vmatpush3.xpose.msk.msra.mxu0 %vm72_vm0, %v38_v13 }
  0x18   :  { %418 = vmatprep.subr.msk.mxu0 %vm72_vm0, %v37_v16 }
  0x1b   :  { %419 = vmatpush3.xpose.msk.msra.mxu0 %vm72_vm0, %v37_v16 }
  0x1c   :  { %420 = vmatprep.subr.msk.mxu0 %vm72_vm0, %v36_v17 }
  0x1f   :  { %421 = vmatpush3.xpose.msk.msra.mxu0 %vm72_vm0, %v36_v17 }
  0x20   :  { %422 = vmatprep.subr.msk.mxu0 %vm72_vm0, %v35_v18 }
  0x23   :  { %423 = vmatpush3.xpose.msk.msra.mxu0 %vm72_vm0, %v35_v18 }
  0x24   :  { %424 = vmatprep.subr.msk.mxu0 %vm72_vm0, %v34_v19 }
  0x27   :  { %425 = vmatpush3.xpose.msk.msra.mxu0 %vm72_vm0, %v34_v19 }
  0x28   :  { %426 = vmatprep.subr.msk.mxu0 %vm72_vm0, %v33_v20 }
  0x2b   :  { %427 = vmatpush3.xpose.msk.msra.mxu0 %vm72_vm0, %v33_v20 }
  0x2c   :  { %428 = vmatprep.subr.msk.mxu0 %vm72_vm0, %v32_v21 }
  0x2f   :  { %429 = vmatpush3.xpose.msk.msra.mxu0 %vm72_vm0, %v32_v21 }
  0x30   :  { %430 = vmatprep.subr.msk.mxu0 %vm72_vm0, %v31_v22 }
  0x33   :  { %431 = vmatpush3.xpose.msk.msra.mxu0 %vm72_vm0, %v31_v22 }
  0x34   :  { %432 = vmatprep.subr.msk.mxu0 %vm72_vm0, %v30_v23 }
  0x37   :  { %433 = vmatpush3.xpose.msk.msra.mxu0 %vm72_vm0, %v30_v23 }
  0x38   :  { %434 = vmatprep.subr.msk.mxu0 %vm72_vm0, %v29_v24 }
  0x3b   :  { %435 = vmatpush3.xpose.msk.msra.mxu0 %vm72_vm0, %v29_v24 }
  0x3c   :  { %436 = vmatprep.subr.msk.mxu0 %vm72_vm0, %v28_v25 }
  0x3f   :  { %437 = vmatpush3.xpose.msk.msra.mxu0 %vm72_vm0, %v28_v25 }
  0x42   :  { %439 = vmatmul.mubr.msk.f32.vlgmr.msra.gmra.mxu0 %vm72_vm0, %v45_v26 }
  0x43   :  { %441 = vmatprep.mubr.msk.f32.mxu0 %vm72_vm0, %v46_v27 }
  0x46   :  { %442 = vmatmul.mubr.msk.f32.gmra.mxu0 %vm72_vm0, %v47_v28 }
  0x7f   :  { %v70_v30 = vpop.permute.xlu0 %69 }
  0x80   :  { %v60_v32 = vpop.permute.xlu1 %59 }
  0x84   :  { %v65_v36 = vpop.permute.xlu0 %64  ;;  %v55_v41 = vpop.permute.xlu1 %54 }
  0x88   :  { %v229_v47 = vpop.permute.xlu0 %228  ;;  %v234_v48 = vpop.permute.xlu1 %233 }
  0x8c   :  { %v324_v55 = vpop.permute.xlu0 %323  ;;  %v329_v56 = vpop.permute.xlu1 %328 }
 0x102   :  { %v440_v31 = vpop.f32.mrf.mxu0 }
 0x103   :  { %v205_v38 = vadd.f32 %v440_v31, %v60_v32 }
 0x104   :  { %v199_v33 = vpop.f32.mrf.mxu0 }
 0x105   :  { %v200_v42 = vadd.f32 %v199_v33, %v55_v41  ;;  %v219_v44 = vmax.f32 %v205_v38, 0.0 }
 0x106   :  { %v443_v34 = vpop.f32.mrf.mxu0 }
 0x107   :  { %v215_v35 = vadd.f32 %v443_v34, %v70_v30  ;;  %v218_v45 = vmax.f32 %v200_v42, 0.0 }
 0x108   :  { %v209_v37 = vpop.f32.mrf.mxu0 }
 0x109   :  { %v221_v39 = vmax.f32 %v215_v35, 0.0  ;;  %v210_v40 = vadd.f32 %v209_v37, %v65_v36 }
 0x10b   :  { %v220_v43 = vmax.f32 %v210_v40, 0.0  ;;  %444 = vmatprep.subr.mxu1 %v221_v39 }
 0x10c   :  { %445 = vmatpush3.msra.mxu1 %v221_v39 }
 0x10d   :  { %446 = vmatprep.subr.mxu1 %v220_v43 }
 0x10e   :  { %447 = vmatpush3.msra.mxu1 %v220_v43 }
 0x10f   :  { %448 = vmatprep.subr.mxu1 %v219_v44 }
 0x110   :  { %449 = vmatpush3.msra.mxu1 %v219_v44 }
 0x111   :  { %450 = vmatprep.subr.mxu1 %v218_v45 }
 0x112   :  { %451 = vmatpush3.msra.mxu1 %v218_v45 }
 0x113   :  { %453 = vmatmul.mubr.msk.f32.vlgmr.msra.gmra.mxu1 %vm72_vm0, %v223_v46 }
 0x1d3   :  { %v454_v49 = vpop.f32.mrf.mxu1 }
 0x1d4   :  { %v314_v50 = vadd.f32 %v454_v49, %v234_v48 }
 0x1d5   :  { %v308_v51 = vpop.f32.mrf.mxu1 }
 0x1d6   :  { %v318_v52 = vmax.f32 %v314_v50, 0.0  ;;  %v309_v53 = vadd.f32 %v308_v51, %v229_v47 }
 0x1d8   :  { %v317_v54 = vmax.f32 %v309_v53, 0.0  ;;  %v332_v57 = vmul.f32 %v329_v56, %v318_v52 }
 0x1da   :  { %v331_v58 = vmul.f32 %v324_v55, %v317_v54 }
 0x1dc   :  { %v333_v59 = vadd.f32 %v332_v57, %v331_v58 }
 0x1de   :  { %v334_v60 = vrot.slane %v333_v59, 4 }
 0x1e0   :  { %v335_v61 = vadd.f32 %v334_v60, %v333_v59 }
 0x1e2   :  { %v336_v62 = vrot.slane %v335_v61, 2 }
 0x1e4   :  { %v337_v63 = vadd.f32 %v336_v62, %v335_v61 }
 0x1e6   :  { %v338_v0 = vrot.slane %v337_v63, 1 }
 0x1e8   :  { %v339_v2 = vadd.f32 %v338_v0, %v337_v63 }
 0x1ea   :  { %v342_v3 = vadd.f32 %v341_v1, %v339_v2 }
 0x1ec   :  { %343 = vst [vmem:[#allocation3] sm:$0x1] %v342_v3 }
 0x1ed   :  { %470 = shalt.err (!%p467_p4)
}
 0x1ee   :  { %353 = dma.vmem_to_hbm [thread:$0]  %s351_s5, 16, %s664_s7, [#allocation4]  }
 0x1ef   :  { %479 = dma.done.wait [#allocation4], 16  }
 0x1f0   :  { %480 = vsyncadd [#allocation4], 4294967280 }
 0x1f1   :  { %357 = vsyncpa [#allocation4], 1 }

</bundles_post_ra>
